<compile_context>
chip_gen: v5e
topology: v5e:2x2
jax: 0.10.0
libtpu: 0.0.40
codegen_flags: <defaults>
</compile_context>

<pallas_src>
import jax
import jax.numpy as jnp
from jax.experimental import pallas as pl
from jax.experimental.pallas import tpu as pltpu

LANE = 128        # lane width (last-dim granule)
BATCH_TILE = 128  # rows per grid step (sublane-dense, full MXU rows)


def _round_up(x, m):
    return (x + m - 1) // m * m


# ----------------------------- Pallas kernel --------------------------------

def _mlp_fwd_kernel(x_ref, w1_ref, b1_ref, w2_ref, b2_ref, o_ref):
    # x: [TB, Dp] bf16, w1: [Dp, Hp] bf16, b1: [1, Hp] f32,
    # w2: [Hp, Cp] bf16, b2: [1, Cp] f32, o: [TB, Cp] f32
    h = jnp.dot(x_ref[...], w1_ref[...], preferred_element_type=jnp.float32)
    h = jnp.maximum(h + b1_ref[...], 0.0)                 # bias + ReLU in f32 (VPU)
    out = jnp.dot(h.astype(w2_ref.dtype), w2_ref[...],    # bf16 into the MXU again
                  preferred_element_type=jnp.float32)
    o_ref[...] = (out + b2_ref[...]).astype(o_ref.dtype)


def mlp_forward_pallas(x_pad, w1, b1, w2, b2, *, tb=BATCH_TILE):
    """Fused 2-layer MLP on lane-padded, batch-tiled operands.

    x_pad: [Bp, Dp] bf16 (Bp % tb == 0, Dp % 128 == 0)
    w1:    [Dp, Hp] bf16      b1: [1, Hp] f32
    w2:    [Hp, Cp] bf16      b2: [1, Cp] f32
    returns logits_pad: [Bp, Cp] f32
    """
    Bp, Dp = x_pad.shape
    Hp = w1.shape[1]
    Cp = w2.shape[1]
    assert Bp % tb == 0 and Dp % LANE == 0 and Hp % LANE == 0 and Cp % LANE == 0

    flops = 2 * Bp * (Dp * Hp + Hp * Cp)
    bytes_accessed = (
        x_pad.size * 2 + w1.size * 2 + w2.size * 2      # bf16 operands
        + b1.size * 4 + b2.size * 4 + Bp * Cp * 4       # f32 biases + f32 output
    )

    return pl.pallas_call(
        _mlp_fwd_kernel,
        out_shape=jax.ShapeDtypeStruct((Bp, Cp), jnp.float32),
        grid_spec=pltpu.PrefetchScalarGridSpec(
            num_scalar_prefetch=0,
            grid=(Bp // tb,),
            in_specs=[
                pl.BlockSpec((tb, Dp), lambda i: (i, 0)),   # activations: tiled over batch
                pl.BlockSpec((Dp, Hp), lambda i: (0, 0)),   # weights resident across tiles
                pl.BlockSpec((1, Hp), lambda i: (0, 0)),
                pl.BlockSpec((Hp, Cp), lambda i: (0, 0)),
                pl.BlockSpec((1, Cp), lambda i: (0, 0)),
            ],
            out_specs=pl.BlockSpec((tb, Cp), lambda i: (i, 0)),  # lane-dense output slab
        ),
        compiler_params=pltpu.CompilerParams(
            dimension_semantics=("parallel",),   # shard batch tiles across v7x's 2 TCs
        ),
        cost_estimate=pl.CostEstimate(
            flops=flops, transcendentals=0, bytes_accessed=bytes_accessed),
    )(x_pad, w1, b1, w2, b2)


# -------------------------- BaseWrapper equivalent ---------------------------

class BaseWrapperJAX:
    """JAX equivalent of BaseWrapper: forward(x) = self.net(x)."""

    def __init__(self, net=None):
        self.net = net

    def forward(self, x):
        return self.net(x)

    __call__ = forward


def make_net(key, d_in, d_hidden, d_out):
    """Initialize a Linear->ReLU->Linear net (PyTorch-style uniform init), pad the
    parameters to TPU lane granularity ONCE, cast weights to bf16 ONCE, and return a
    callable running the fused Pallas forward kernel plus the f32 master params."""
    k1, k2, k3, k4 = jax.random.split(key, 4)
    bound1 = 1.0 / (d_in ** 0.5)
    bound2 = 1.0 / (d_hidden ** 0.5)
    w1 = jax.random.uniform(k1, (d_in, d_hidden), jnp.float32, -bound1, bound1)
    b1 = jax.random.uniform(k2, (1, d_hidden), jnp.float32, -bound1, bound1)
    w2 = jax.random.uniform(k3, (d_hidden, d_out), jnp.float32, -bound2, bound2)
    b2 = jax.random.uniform(k4, (1, d_out), jnp.float32, -bound2, bound2)

    # --- one-time padding (zeros) + weight cast to bf16 ---
    dp = _round_up(d_in, LANE)
    hp = _round_up(d_hidden, LANE)
    cp = _round_up(d_out, LANE)
    w1p = jnp.zeros((dp, hp), jnp.bfloat16).at[:d_in, :d_hidden].set(
        w1.astype(jnp.bfloat16))
    b1p = jnp.zeros((1, hp), jnp.float32).at[:, :d_hidden].set(b1)
    w2p = jnp.zeros((hp, cp), jnp.bfloat16).at[:d_hidden, :d_out].set(
        w2.astype(jnp.bfloat16))
    b2p = jnp.zeros((1, cp), jnp.float32).at[:, :d_out].set(b2)

    @jax.jit
    def net(x):
        b, d = x.shape
        bp = _round_up(b, BATCH_TILE)
        x_pad = jnp.zeros((bp, dp), jnp.bfloat16).at[:b, :d].set(
            x.astype(jnp.bfloat16))
        logits_pad = mlp_forward_pallas(x_pad, w1p, b1p, w2p, b2p)
        return logits_pad[:b, :d_out]

    return net, (w1, b1, w2, b2)


# --------------------------------- main --------------------------------------

if __name__ == "__main__":
    key = jax.random.PRNGKey(0)
    kx, kp = jax.random.split(key)

    B, D_IN, D_HID, D_OUT = 8, 32, 64, 16
    x = jax.random.normal(kx, (B, D_IN), dtype=jnp.float32)

    net, (w1, b1, w2, b2) = make_net(kp, D_IN, D_HID, D_OUT)
    model = BaseWrapperJAX(net=net)

    out = jax.block_until_ready(model(x))

    # Reference in plain JAX with the same bf16-rounded operands (f32 accumulation).
    xb = x.astype(jnp.bfloat16).astype(jnp.float32)
    w1b = w1.astype(jnp.bfloat16).astype(jnp.float32)
    w2b = w2.astype(jnp.bfloat16).astype(jnp.float32)
    h = jnp.maximum(xb @ w1b + b1, 0.0)
    ref = h.astype(jnp.bfloat16).astype(jnp.float32) @ w2b + b2

    assert out.shape == (B, D_OUT)
    assert jnp.allclose(out, ref, atol=2e-2, rtol=2e-2)

    print("KERNEL_OK")
</pallas_src>

<mosaic_0001>
module attributes {stable_mosaic.version = 11 : i64} {
  func.func @_mlp_fwd_kernel(%arg0: i32, %arg1: memref<128x128xbf16, #tpu.memory_space<vmem>>, %arg2: memref<128x128xbf16, #tpu.memory_space<vmem>>, %arg3: memref<1x128xf32, #tpu.memory_space<vmem>>, %arg4: memref<128x128xbf16, #tpu.memory_space<vmem>>, %arg5: memref<1x128xf32, #tpu.memory_space<vmem>>, %arg6: memref<128x128xf32, #tpu.memory_space<vmem>>) attributes {dimension_semantics = [#tpu.dimension_semantics<parallel>], iteration_bounds = array<i64: 1>, scalar_prefetch = 0 : i64, scratch_operands = 0 : i64, tpu.core_type = #tpu.core_type<tc>, window_params = [{transform_indices = @transform_0, window_bounds = array<i64: 128, 128>}, {pipeline_mode = #tpu.pipeline_mode<synchronous>, transform_indices = @transform_1, window_bounds = array<i64: 128, 128>}, {pipeline_mode = #tpu.pipeline_mode<synchronous>, transform_indices = @transform_2, window_bounds = array<i64: 1, 128>}, {pipeline_mode = #tpu.pipeline_mode<synchronous>, transform_indices = @transform_3, window_bounds = array<i64: 128, 128>}, {pipeline_mode = #tpu.pipeline_mode<synchronous>, transform_indices = @transform_4, window_bounds = array<i64: 1, 128>}, {transform_indices = @transform_5, window_bounds = array<i64: 128, 128>}]} {
    %c0 = arith.constant 0 : index
    %c0_0 = arith.constant 0 : index
    %0 = vector.load %arg1[%c0, %c0_0] : memref<128x128xbf16, #tpu.memory_space<vmem>>, vector<128x128xbf16>
    %c0_1 = arith.constant 0 : index
    %c0_2 = arith.constant 0 : index
    %1 = vector.load %arg2[%c0_1, %c0_2] : memref<128x128xbf16, #tpu.memory_space<vmem>>, vector<128x128xbf16>
    %cst = arith.constant dense<0.000000e+00> : vector<128x128xf32>
    %2 = tpu.matmul %0, %1, %cst {dimension_numbers = #tpu.dot_dimension_numbers<[1], [0], [0], [1], [0, 0, 1, 1], [], []>} : vector<128x128xbf16>, vector<128x128xbf16>, vector<128x128xf32> -> vector<128x128xf32>
    %c0_3 = arith.constant 0 : index
    %c0_4 = arith.constant 0 : index
    %3 = vector.load %arg3[%c0_3, %c0_4] : memref<1x128xf32, #tpu.memory_space<vmem>>, vector<1x128xf32>
    %4 = vector.broadcast %3 : vector<1x128xf32> to vector<128x128xf32>
    %5 = arith.addf %2, %4 : vector<128x128xf32>
    %cst_5 = arith.constant 0.000000e+00 : f32
    %6 = vector.broadcast %cst_5 : f32 to vector<128x128xf32>
    %7 = arith.maximumf %5, %6 : vector<128x128xf32>
    %8 = arith.truncf %7 : vector<128x128xf32> to vector<128x128xbf16>
    %c0_6 = arith.constant 0 : index
    %c0_7 = arith.constant 0 : index
    %9 = vector.load %arg4[%c0_6, %c0_7] : memref<128x128xbf16, #tpu.memory_space<vmem>>, vector<128x128xbf16>
    %cst_8 = arith.constant dense<0.000000e+00> : vector<128x128xf32>
    %10 = tpu.matmul %8, %9, %cst_8 {dimension_numbers = #tpu.dot_dimension_numbers<[1], [0], [0], [1], [0, 0, 1, 1], [], []>} : vector<128x128xbf16>, vector<128x128xbf16>, vector<128x128xf32> -> vector<128x128xf32>
    %c0_9 = arith.constant 0 : index
    %c0_10 = arith.constant 0 : index
    %11 = vector.load %arg5[%c0_9, %c0_10] : memref<1x128xf32, #tpu.memory_space<vmem>>, vector<1x128xf32>
    %12 = vector.broadcast %11 : vector<1x128xf32> to vector<128x128xf32>
    %13 = arith.addf %10, %12 : vector<128x128xf32>
    %c0_11 = arith.constant 0 : index
    %c0_12 = arith.constant 0 : index
    %14 = vector.load %arg6[%c0_11, %c0_12] : memref<128x128xf32, #tpu.memory_space<vmem>>, vector<128x128xf32>
    tpu.vector_store %arg6[%c0_11, %c0_12], %13 {strides = array<i32>} : memref<128x128xf32, #tpu.memory_space<vmem>>, vector<128x128xf32>,
    return
  }
  func.func @transform_0(%arg0: i32) -> (i32, i32) {
    %c0_i32 = arith.constant 0 : i32
    %c0_i32_0 = arith.constant 0 : i32
    return %arg0, %c0_i32 : i32, i32
  }
  func.func @transform_1(%arg0: i32) -> (i32, i32) {
    %c0_i32 = arith.constant 0 : i32
    %c0_i32_0 = arith.constant 0 : i32
    %c0_i32_1 = arith.constant 0 : i32
    return %c0_i32, %c0_i32_0 : i32, i32
  }
  func.func @transform_2(%arg0: i32) -> (i32, i32) {
    %c0_i32 = arith.constant 0 : i32
    %c0_i32_0 = arith.constant 0 : i32
    %c0_i32_1 = arith.constant 0 : i32
    return %c0_i32, %c0_i32_0 : i32, i32
  }
  func.func @transform_3(%arg0: i32) -> (i32, i32) {
    %c0_i32 = arith.constant 0 : i32
    %c0_i32_0 = arith.constant 0 : i32
    %c0_i32_1 = arith.constant 0 : i32
    return %c0_i32, %c0_i32_0 : i32, i32
  }
  func.func @transform_4(%arg0: i32) -> (i32, i32) {
    %c0_i32 = arith.constant 0 : i32
    %c0_i32_0 = arith.constant 0 : i32
    %c0_i32_1 = arith.constant 0 : i32
    return %c0_i32, %c0_i32_0 : i32, i32
  }
  func.func @transform_5(%arg0: i32) -> (i32, i32) {
    %c0_i32 = arith.constant 0 : i32
    %c0_i32_0 = arith.constant 0 : i32
    return %arg0, %c0_i32 : i32, i32
  }
}

</mosaic_0001>

<bundles_post_ra>
// kernel: net.1
= control target key start
LH: loop header
LB: loop body
LE: loop exit
PB: predicated region body
PF: predicated region fallthrough
CT: control target
= control target key end

     0   :  { %10 = vsyncpa [#allocation3], 0  ;;  %s546_s21 = smov [#allocation2]   ;;  %s547_s23 = smov 64   ;;  %s684_s0 = inlined_call_operand.vmem [shape: bf16[128,128], index: 0, kind: input, shape index: {}]   ;;  %s685_s1 = inlined_call_operand.hbm [shape: bf16[128,128], index: 1, kind: input, shape index: {}]   ;;  %s686_s2 = inlined_call_operand.vmem [shape: f32[1,128], index: 2, kind: input, shape index: {}]   ;;  %s687_s3 = inlined_call_operand.vmem [shape: bf16[128,128], index: 3, kind: input, shape index: {}]   ;;  %s688_s4 = inlined_call_operand.vmem [shape: f32[1,128], index: 4, kind: input, shape index: {}]   ;;  %s689_s5 = inlined_call_operand.vmem [shape: f32[128,128], index: 5, kind: output, shape index: {}]  }
   0x1   :  { %s17_s20 = sshll.u32 %s685_s1, 4  ;;  %s19_s22 = sshll.u32 %s546_s21, 4  ;;  %s18_s20 = int_to_ptr.hbm [resolvable:$true] %s17_s20  ;;  %s20_s22 = int_to_ptr.vmem [resolvable:$true] %s19_s22 }
   0x2   :  { %s548_s24 = smov 4  }
   0x3   :  { %25 = dma.hbm_to_vmem [thread:$0]  %s18_s20, 1024, %s20_s22, [#allocation3], %s547_s23, %s547_s23, %s548_s24  }
   0x4   :  { %544 = dma.done.wait [#allocation3], 1024  }
   0x5   :  { %545 = vsyncadd [#allocation3], 4294966272  ;;  %v490_v0 = vld [vmem:[#allocation2 + $0x38] sm:$0xff]  ;;  %v489_v1 = vld [vmem:[#allocation2 + $0x30] sm:$0xff] }
   0x6   :  { %168 = vmatpush.bf16.msra.mxu0 %v490_v0  ;;  %499 = vmatpush.bf16.msra.mxu2 %v490_v0  ;;  %v488_v2 = vld [vmem:[#allocation2 + $0x28] sm:$0xff]  ;;  %v487_v3 = vld [vmem:[#allocation2 + $0x20] sm:$0xff]  ;;  %v486_v4 = vld [vmem:[#allocation2 + $0x18] sm:$0xff] }
   0x7   :  { %v485_v5 = vld [vmem:[#allocation2 + $0x10] sm:$0xff]  ;;  %v484_v6 = vld [vmem:[#allocation2 + $0x8] sm:$0xff]  ;;  %v483_v7 = vld [vmem:[#allocation2] sm:$0xff] }
   0x8   :  { %v475_v8 = vld [vmem:[%s684_s0] sm:$0xff]  ;;  %v476_v10 = vld [vmem:[%s684_s0 + $0x8] sm:$0xff]  ;;  %v498_v12 = vld [vmem:[%s687_s3 + $0x38] sm:$0xff] }
   0x9   :  { %v479_v9 = vld [vmem:[%s684_s0 + $0x20] sm:$0xff]  ;;  %v480_v11 = vld [vmem:[%s684_s0 + $0x28] sm:$0xff]  ;;  %309 = vmatpush.bf16.msra.mxu1 %v498_v12  ;;  %v497_v13 = vld [vmem:[%s687_s3 + $0x30] sm:$0xff]  ;;  %507 = vmatpush.bf16.msra.mxu3 %v498_v12 }
   0xa   :  { %169 = vmatpush.bf16.msra.mxu0 %v489_v1  ;;  %500 = vmatpush.bf16.msra.mxu2 %v489_v1  ;;  %v496_v14 = vld [vmem:[%s687_s3 + $0x28] sm:$0xff]  ;;  %v495_v15 = vld [vmem:[%s687_s3 + $0x20] sm:$0xff]  ;;  %v477_v16 = vld [vmem:[%s684_s0 + $0x10] sm:$0xff] }
   0xb   :  { %v481_v17 = vld [vmem:[%s684_s0 + $0x30] sm:$0xff]  ;;  %v478_v18 = vld [vmem:[%s684_s0 + $0x18] sm:$0xff]  ;;  %v492_v22 = vld [vmem:[%s687_s3 + $0x8] sm:$0xff] }
   0xc   :  { %v482_v19 = vld [vmem:[%s684_s0 + $0x38] sm:$0xff]  ;;  %v493_v21 = vld [vmem:[%s687_s3 + $0x10] sm:$0xff]  ;;  %v491_v23 = vld [vmem:[%s687_s3] sm:$0xff] }
   0xd   :  { %310 = vmatpush.bf16.msra.mxu1 %v497_v13  ;;  %508 = vmatpush.bf16.msra.mxu3 %v497_v13  ;;  %v494_v20 = vld [vmem:[%s687_s3 + $0x18] sm:$0xff]  ;;  %v518_v25 = vld [vmem:[%s686_s2] ss:$0 sm:$0xff] }
   0xe   :  { %170 = vmatpush.bf16.msra.mxu0 %v488_v2  ;;  %501 = vmatpush.bf16.msra.mxu2 %v488_v2 }
  0x11   :  { %311 = vmatpush.bf16.msra.mxu1 %v496_v14  ;;  %509 = vmatpush.bf16.msra.mxu3 %v496_v14 }
  0x12   :  { %171 = vmatpush.bf16.msra.mxu0 %v487_v3  ;;  %502 = vmatpush.bf16.msra.mxu2 %v487_v3 }
  0x15   :  { %312 = vmatpush.bf16.msra.mxu1 %v495_v15  ;;  %510 = vmatpush.bf16.msra.mxu3 %v495_v15 }
  0x16   :  { %172 = vmatpush.bf16.msra.mxu0 %v486_v4  ;;  %503 = vmatpush.bf16.msra.mxu2 %v486_v4 }
  0x19   :  { %313 = vmatpush.bf16.msra.mxu1 %v494_v20  ;;  %511 = vmatpush.bf16.msra.mxu3 %v494_v20 }
  0x1a   :  { %173 = vmatpush.bf16.msra.mxu0 %v485_v5  ;;  %504 = vmatpush.bf16.msra.mxu2 %v485_v5 }
  0x1d   :  { %314 = vmatpush.bf16.msra.mxu1 %v493_v21  ;;  %512 = vmatpush.bf16.msra.mxu3 %v493_v21 }
  0x1e   :  { %174 = vmatpush.bf16.msra.mxu0 %v484_v6  ;;  %505 = vmatpush.bf16.msra.mxu2 %v484_v6 }
  0x21   :  { %315 = vmatpush.bf16.msra.mxu1 %v492_v22  ;;  %513 = vmatpush.bf16.msra.mxu3 %v492_v22 }
  0x22   :  { %175 = vmatpush.bf16.msra.mxu0 %v483_v7  ;;  %506 = vmatpush.bf16.msra.mxu2 %v483_v7 }
  0x25   :  { %176 = vmatmul.bf16.vlgmr.msra.gmra.mxu0 %v475_v8  ;;  %196 = vmatmul.bf16.vlgmr.msra.gmra.mxu2 %v479_v9 }
  0x26   :  { %316 = vmatpush.bf16.msra.mxu1 %v491_v23  ;;  %514 = vmatpush.bf16.msra.mxu3 %v491_v23 }
  0x35   :  { %181 = vmatmul.bf16.gmra.mxu0 %v476_v10  ;;  %201 = vmatmul.bf16.gmra.mxu2 %v480_v11 }
  0x45   :  { %186 = vmatmul.bf16.gmra.mxu0 %v477_v16  ;;  %206 = vmatmul.bf16.gmra.mxu2 %v481_v17  ;;  %v519_v17 = vld [vmem:[%s688_s4] ss:$0 sm:$0xff] }
  0x55   :  { %191 = vmatmul.bf16.gmra.mxu0 %v478_v18  ;;  %211 = vmatmul.bf16.gmra.mxu2 %v482_v19 }
  0xa2   :  { %v177_v24 = vpop.f32.mrf.mxu0 }
  0xa3   :  { %v178_v26 = vadd.f32 %v518_v25, %v177_v24 }
  0xa5   :  { %v217_v29 = vmax.f32 %v178_v26, 0.0 }
  0xa8   :  { %v197_v27 = vpop.f32.mrf.mxu2 }
  0xa9   :  { %v198_v32 = vadd.f32 %v518_v25, %v197_v27 }
  0xaa   :  { %v179_v28 = vpop.f32.mrf.mxu0 }
  0xab   :  { %v180_v30 = vadd.f32 %v518_v25, %v179_v28  ;;  %v225_v37 = vmax.f32 %v198_v32, 0.0 }
  0xad   :  { %v218_v31 = vmax.f32 %v180_v30, 0.0 }
  0xaf   :  { %v233_v33 = vpack.c.bf16 %v218_v31, %v217_v29 }
  0xb0   :  { %v199_v34 = vpop.f32.mrf.mxu2 }
  0xb1   :  { %v200_v35 = vadd.f32 %v518_v25, %v199_v34  ;;  %317 = vmatmul.bf16.vlgmr.msra.gmra.mxu1 %v233_v33 }
  0xb2   :  { %v182_v36 = vpop.f32.mrf.mxu0 }
  0xb3   :  { %v226_v38 = vmax.f32 %v200_v35, 0.0  ;;  %v183_v40 = vadd.f32 %v518_v25, %v182_v36 }
  0xb5   :  { %v237_v39 = vpack.c.bf16 %v226_v38, %v225_v37  ;;  %v219_v43 = vmax.f32 %v183_v40, 0.0 }
  0xb7   :  { %337 = vmatmul.bf16.vlgmr.msra.gmra.mxu3 %v237_v39 }
  0xb8   :  { %v202_v41 = vpop.f32.mrf.mxu2 }
  0xb9   :  { %v203_v46 = vadd.f32 %v518_v25, %v202_v41 }
  0xba   :  { %v184_v42 = vpop.f32.mrf.mxu0 }
  0xbb   :  { %v185_v44 = vadd.f32 %v518_v25, %v184_v42  ;;  %v227_v51 = vmax.f32 %v203_v46, 0.0 }
  0xbd   :  { %v220_v45 = vmax.f32 %v185_v44, 0.0 }
  0xbf   :  { %v234_v47 = vpack.c.bf16 %v220_v45, %v219_v43 }
  0xc0   :  { %v204_v48 = vpop.f32.mrf.mxu2 }
  0xc1   :  { %v205_v49 = vadd.f32 %v518_v25, %v204_v48  ;;  %322 = vmatmul.bf16.gmra.mxu1 %v234_v47 }
  0xc2   :  { %v187_v50 = vpop.f32.mrf.mxu0 }
  0xc3   :  { %v228_v52 = vmax.f32 %v205_v49, 0.0  ;;  %v188_v54 = vadd.f32 %v518_v25, %v187_v50 }
  0xc5   :  { %v238_v53 = vpack.c.bf16 %v228_v52, %v227_v51  ;;  %v221_v57 = vmax.f32 %v188_v54, 0.0 }
  0xc7   :  { %342 = vmatmul.bf16.gmra.mxu3 %v238_v53 }
  0xc8   :  { %v207_v55 = vpop.f32.mrf.mxu2 }
  0xc9   :  { %v208_v60 = vadd.f32 %v518_v25, %v207_v55 }
  0xca   :  { %v189_v56 = vpop.f32.mrf.mxu0 }
  0xcb   :  { %v190_v58 = vadd.f32 %v518_v25, %v189_v56  ;;  %v229_v1 = vmax.f32 %v208_v60, 0.0 }
  0xcd   :  { %v222_v59 = vmax.f32 %v190_v58, 0.0 }
  0xcf   :  { %v235_v61 = vpack.c.bf16 %v222_v59, %v221_v57 }
  0xd0   :  { %v209_v62 = vpop.f32.mrf.mxu2 }
  0xd1   :  { %v210_v63 = vadd.f32 %v518_v25, %v209_v62  ;;  %327 = vmatmul.bf16.gmra.mxu1 %v235_v61 }
  0xd2   :  { %v192_v0 = vpop.f32.mrf.mxu0 }
  0xd3   :  { %v230_v2 = vmax.f32 %v210_v63, 0.0  ;;  %v193_v4 = vadd.f32 %v518_v25, %v192_v0 }
  0xd5   :  { %v239_v3 = vpack.c.bf16 %v230_v2, %v229_v1  ;;  %v223_v7 = vmax.f32 %v193_v4, 0.0 }
  0xd7   :  { %347 = vmatmul.bf16.gmra.mxu3 %v239_v3 }
  0xd8   :  { %v212_v5 = vpop.f32.mrf.mxu2 }
  0xd9   :  { %v213_v10 = vadd.f32 %v518_v25, %v212_v5 }
  0xda   :  { %v194_v6 = vpop.f32.mrf.mxu0 }
  0xdb   :  { %v195_v8 = vadd.f32 %v518_v25, %v194_v6  ;;  %v231_v14 = vmax.f32 %v213_v10, 0.0 }
  0xdd   :  { %v224_v9 = vmax.f32 %v195_v8, 0.0 }
  0xdf   :  { %v236_v11 = vpack.c.bf16 %v224_v9, %v223_v7 }
  0xe0   :  { %v214_v12 = vpop.f32.mrf.mxu2 }
  0xe1   :  { %v215_v13 = vadd.f32 %v518_v25, %v214_v12  ;;  %332 = vmatmul.bf16.gmra.mxu1 %v236_v11 }
  0xe3   :  { %v232_v15 = vmax.f32 %v215_v13, 0.0 }
  0xe5   :  { %v240_v16 = vpack.c.bf16 %v232_v15, %v231_v14 }
  0xe7   :  { %352 = vmatmul.bf16.gmra.mxu3 %v240_v16 }
 0x12e   :  { %v318_v18 = vpop.f32.mrf.mxu1 }
 0x12f   :  { %v319_v19 = vadd.f32 %v519_v17, %v318_v18 }
 0x131   :  { %358 = vst [vmem:[%s689_s5] sm:$0xff] %v319_v19 }
 0x136   :  { %v320_v20 = vpop.f32.mrf.mxu1 }
 0x137   :  { %v321_v21 = vadd.f32 %v519_v17, %v320_v20 }
 0x139   :  { %359 = vst [vmem:[%s689_s5 + $0x8] sm:$0xff] %v321_v21 }
 0x13a   :  { %v338_v22 = vpop.f32.mrf.mxu3 }
 0x13b   :  { %v339_v23 = vadd.f32 %v519_v17, %v338_v22 }
 0x13d   :  { %366 = vst [vmem:[%s689_s5 + $0x40] sm:$0xff] %v339_v23 }
 0x13e   :  { %v323_v24 = vpop.f32.mrf.mxu1 }
 0x13f   :  { %v324_v25 = vadd.f32 %v519_v17, %v323_v24 }
 0x141   :  { %360 = vst [vmem:[%s689_s5 + $0x10] sm:$0xff] %v324_v25 }
 0x142   :  { %v340_v26 = vpop.f32.mrf.mxu3 }
 0x143   :  { %v341_v27 = vadd.f32 %v519_v17, %v340_v26 }
 0x145   :  { %367 = vst [vmem:[%s689_s5 + $0x48] sm:$0xff] %v341_v27 }
 0x146   :  { %v325_v28 = vpop.f32.mrf.mxu1 }
 0x147   :  { %v326_v29 = vadd.f32 %v519_v17, %v325_v28 }
 0x149   :  { %361 = vst [vmem:[%s689_s5 + $0x18] sm:$0xff] %v326_v29 }
 0x14a   :  { %v343_v30 = vpop.f32.mrf.mxu3 }
 0x14b   :  { %v344_v31 = vadd.f32 %v519_v17, %v343_v30 }
 0x14d   :  { %368 = vst [vmem:[%s689_s5 + $0x50] sm:$0xff] %v344_v31 }
 0x14e   :  { %v328_v32 = vpop.f32.mrf.mxu1 }
 0x14f   :  { %v329_v33 = vadd.f32 %v519_v17, %v328_v32 }
 0x151   :  { %362 = vst [vmem:[%s689_s5 + $0x20] sm:$0xff] %v329_v33 }
 0x152   :  { %v345_v34 = vpop.f32.mrf.mxu3 }
 0x153   :  { %v346_v35 = vadd.f32 %v519_v17, %v345_v34 }
 0x155   :  { %369 = vst [vmem:[%s689_s5 + $0x58] sm:$0xff] %v346_v35 }
 0x156   :  { %v330_v36 = vpop.f32.mrf.mxu1 }
 0x157   :  { %v331_v37 = vadd.f32 %v519_v17, %v330_v36 }
 0x159   :  { %363 = vst [vmem:[%s689_s5 + $0x28] sm:$0xff] %v331_v37 }
 0x15a   :  { %v348_v38 = vpop.f32.mrf.mxu3 }
 0x15b   :  { %v349_v39 = vadd.f32 %v519_v17, %v348_v38 }
 0x15d   :  { %370 = vst [vmem:[%s689_s5 + $0x60] sm:$0xff] %v349_v39 }
 0x15e   :  { %v333_v40 = vpop.f32.mrf.mxu1 }
 0x15f   :  { %v334_v41 = vadd.f32 %v519_v17, %v333_v40 }
 0x161   :  { %364 = vst [vmem:[%s689_s5 + $0x30] sm:$0xff] %v334_v41 }
 0x162   :  { %v350_v42 = vpop.f32.mrf.mxu3 }
 0x163   :  { %v351_v43 = vadd.f32 %v519_v17, %v350_v42 }
 0x165   :  { %371 = vst [vmem:[%s689_s5 + $0x68] sm:$0xff] %v351_v43 }
 0x166   :  { %v335_v44 = vpop.f32.mrf.mxu1 }
 0x167   :  { %v336_v45 = vadd.f32 %v519_v17, %v335_v44 }
 0x169   :  { %365 = vst [vmem:[%s689_s5 + $0x38] sm:$0xff] %v336_v45 }
 0x16a   :  { %v353_v46 = vpop.f32.mrf.mxu3 }
 0x16b   :  { %v354_v47 = vadd.f32 %v519_v17, %v353_v46 }
 0x16d   :  { %372 = vst [vmem:[%s689_s5 + $0x70] sm:$0xff] %v354_v47 }
 0x172   :  { %v355_v48 = vpop.f32.mrf.mxu3 }
 0x173   :  { %v356_v49 = vadd.f32 %v519_v17, %v355_v48 }
 0x175   :  { %373 = vst [vmem:[%s689_s5 + $0x78] sm:$0xff] %v356_v49 }
 0x176   :  { %378 = vsyncpa [#allocation3], 1 }

</bundles_post_ra>
